<compile_context>
chip_gen: v5e
topology: v5e:2x2
jax: 0.10.0
libtpu: 0.0.40
codegen_flags: <defaults>
</compile_context>

<pallas_src>
import jax
import jax.numpy as jnp
from jax import lax
from jax.experimental import pallas as pl
from jax.experimental.pallas import tpu as pltpu


def _rbf_cov_kernel(params_ref, xi_ref, xj_ref, ni_ref, nj_ref, cov_ref):
    """One (TM, TN) tile of the scaled-RBF covariance matrix.

    params_ref: SMEM (2,) f32  -> [1/lengthscale^2, outputscale]
    xi_ref:     VMEM (TM, D)   row tile of x (unscaled)
    xj_ref:     VMEM (TN, D)   column tile of x (unscaled)
    ni_ref:     VMEM (TM, 1)   precomputed row squared norms
    nj_ref:     VMEM (1, TN)   precomputed column squared norms
    cov_ref:    VMEM (TM, TN)  output tile
    """
    inv_ls2 = params_ref[0]
    outputscale = params_ref[1]

    # Contract on the last dim of both operands -> feeds the MXU directly,
    # no in-kernel transpose (keeps the XLU slot free for nothing at all).
    gram = lax.dot_general(
        xi_ref[...], xj_ref[...],
        dimension_numbers=(((1,), (1,)), ((), ())),
        preferred_element_type=jnp.float32)                    # (TM, TN)

    # ||xi - xj||^2 = ||xi||^2 + ||xj||^2 - 2 xi.xj  (clamp numerical negatives),
    # then fold the lengthscale in as a single VPU multiply.
    d2 = ni_ref[...] + nj_ref[...] - 2.0 * gram                # (TM,1)+(1,TN) broadcast
    d2 = jnp.maximum(d2, 0.0) * inv_ls2

    cov_ref[...] = outputscale * jnp.exp(-0.5 * d2)


def _pick_tile(npad, cap=512):
    """Largest lane/sublane-friendly tile <= cap that divides the padded N.

    npad is always a multiple of 128, so this returns at least 128. The cap of 512
    keeps TM*TN*4B (double-buffered) well under the v5e 16 MiB default scoped VMEM.
    """
    for t in (512, 256, 128):
        if t <= cap and npad % t == 0:
            return t
    return 128


def gp_classification_forward(x, lengthscale, outputscale):
    """x: (N, D, 1) float32 (matches the torch forward's trailing squeeze(-1)).

    Returns (mean, covariance) of the latent MultivariateNormal:
      mean: (N,)   covariance: (N, N)
    """
    x2d = jnp.squeeze(x, axis=-1).astype(jnp.float32)          # (N, D)
    n, d = x2d.shape

    # Pad N up to a multiple of 128 for unmasked, lane-dense output stores.
    npad = ((n + 127) // 128) * 128
    tm = _pick_tile(npad)
    tn = _pick_tile(npad)

    x_pad = jnp.zeros((npad, d), jnp.float32).at[:n, :].set(x2d)
    sq = jnp.sum(x_pad * x_pad, axis=-1)                       # (Npad,)
    ni = sq.reshape(npad, 1)                                   # row norms
    nj = sq.reshape(1, npad)                                   # column norms

    ls = jnp.float32(lengthscale)
    params = jnp.array([1.0 / (ls * ls), outputscale], dtype=jnp.float32)

    grid = (npad // tm, npad // tn)

    cov_pad = pl.pallas_call(
        _rbf_cov_kernel,
        out_shape=jax.ShapeDtypeStruct((npad, npad), jnp.float32),
        grid=grid,
        in_specs=[
            pl.BlockSpec(memory_space=pltpu.SMEM),             # [1/ls^2, outputscale]
            pl.BlockSpec((tm, d), lambda i, j: (i, 0)),        # row tile of x
            pl.BlockSpec((tn, d), lambda i, j: (j, 0)),        # column tile of x
            pl.BlockSpec((tm, 1), lambda i, j: (i, 0)),        # row norms
            pl.BlockSpec((1, tn), lambda i, j: (0, j)),        # column norms
        ],
        out_specs=pl.BlockSpec((tm, tn), lambda i, j: (i, j)),
        compiler_params=pltpu.CompilerParams(
            dimension_semantics=("parallel", "parallel")),
    )(params, x_pad, x_pad, ni, nj)

    # ZeroMean: free in XLA; kept out of the kernel (no extra output DMA stream).
    mean = jnp.zeros((n,), jnp.float32)
    return mean, cov_pad[:n, :n]


def _reference(x, lengthscale, outputscale):
    x2d = jnp.squeeze(x, axis=-1).astype(jnp.float32) / lengthscale
    d2 = jnp.sum((x2d[:, None, :] - x2d[None, :, :]) ** 2, axis=-1)
    cov = outputscale * jnp.exp(-0.5 * d2)
    return jnp.zeros(x2d.shape[0], jnp.float32), cov


if __name__ == "__main__":
    key = jax.random.PRNGKey(0)

    # Deterministic "trained" hyperparameters (softplus-style positive values).
    lengthscale = 1.5
    outputscale = 2.0

    # Case 1: small, N already below one 128-padded tile.
    k1, k2 = jax.random.split(key)
    N1, D = 64, 8
    x1 = jax.random.normal(k1, (N1, D, 1), dtype=jnp.float32)
    mean1, cov1 = gp_classification_forward(x1, lengthscale, outputscale)
    jax.block_until_ready((mean1, cov1))
    ref_mean1, ref_cov1 = _reference(x1, lengthscale, outputscale)
    assert mean1.shape == (N1,) and cov1.shape == (N1, N1)
    assert jnp.allclose(mean1, ref_mean1, atol=1e-5)
    assert jnp.allclose(cov1, ref_cov1, atol=1e-4, rtol=1e-4)

    # Case 2: N not a multiple of 128 -> exercises padding + multi-tile 2D grid.
    N2 = 200
    x2 = jax.random.normal(k2, (N2, D, 1), dtype=jnp.float32)
    mean2, cov2 = gp_classification_forward(x2, lengthscale, outputscale)
    jax.block_until_ready((mean2, cov2))
    ref_mean2, ref_cov2 = _reference(x2, lengthscale, outputscale)
    assert mean2.shape == (N2,) and cov2.shape == (N2, N2)
    assert jnp.allclose(mean2, ref_mean2, atol=1e-5)
    assert jnp.allclose(cov2, ref_cov2, atol=1e-4, rtol=1e-4)

    print("KERNEL_OK")
</pallas_src>

<mosaic_0001>
module attributes {stable_mosaic.version = 11 : i64} {
  func.func @_rbf_cov_kernel(%arg0: i32, %arg1: i32, %arg2: memref<2xf32, #tpu.memory_space<smem>>, %arg3: memref<128x8xf32, #tpu.memory_space<vmem>>, %arg4: memref<128x8xf32, #tpu.memory_space<vmem>>, %arg5: memref<128x1xf32, #tpu.memory_space<vmem>>, %arg6: memref<1x128xf32, #tpu.memory_space<vmem>>, %arg7: memref<128x128xf32, #tpu.memory_space<vmem>>) attributes {dimension_semantics = [#tpu.dimension_semantics<parallel>, #tpu.dimension_semantics<parallel>], iteration_bounds = array<i64: 1, 1>, scalar_prefetch = 0 : i64, scratch_operands = 0 : i64, tpu.core_type = #tpu.core_type<tc>, window_params = [{transform_indices = @transform_0, window_bounds = array<i64: 2>}, {transform_indices = @transform_1, window_bounds = array<i64: 128, 8>}, {transform_indices = @transform_2, window_bounds = array<i64: 128, 8>}, {transform_indices = @transform_3, window_bounds = array<i64: 128, 1>}, {transform_indices = @transform_4, window_bounds = array<i64: 1, 128>}, {transform_indices = @transform_5, window_bounds = array<i64: 128, 128>}]} {
    %c0 = arith.constant 0 : index
    %0 = memref.load %arg2[%c0] : memref<2xf32, #tpu.memory_space<smem>>
    %c1 = arith.constant 1 : index
    %1 = memref.load %arg2[%c1] : memref<2xf32, #tpu.memory_space<smem>>
    %c0_0 = arith.constant 0 : index
    %c0_1 = arith.constant 0 : index
    %2 = vector.load %arg3[%c0_0, %c0_1] : memref<128x8xf32, #tpu.memory_space<vmem>>, vector<128x8xf32>
    %c0_2 = arith.constant 0 : index
    %c0_3 = arith.constant 0 : index
    %3 = vector.load %arg4[%c0_2, %c0_3] : memref<128x8xf32, #tpu.memory_space<vmem>>, vector<128x8xf32>
    %cst = arith.constant dense<0.000000e+00> : vector<128x128xf32>
    %4 = tpu.matmul %2, %3, %cst {dimension_numbers = #tpu.dot_dimension_numbers<[1], [1], [0], [0], [0, 0, 1, 0], [], []>} : vector<128x8xf32>, vector<128x8xf32>, vector<128x128xf32> -> vector<128x128xf32>
    %c0_4 = arith.constant 0 : index
    %c0_5 = arith.constant 0 : index
    %5 = vector.load %arg5[%c0_4, %c0_5] : memref<128x1xf32, #tpu.memory_space<vmem>>, vector<128x1xf32>
    %c0_6 = arith.constant 0 : index
    %c0_7 = arith.constant 0 : index
    %6 = vector.load %arg6[%c0_6, %c0_7] : memref<1x128xf32, #tpu.memory_space<vmem>>, vector<1x128xf32>
    %7 = vector.broadcast %5 : vector<128x1xf32> to vector<128x128xf32>
    %8 = vector.broadcast %6 : vector<1x128xf32> to vector<128x128xf32>
    %9 = arith.addf %7, %8 : vector<128x128xf32>
    %cst_8 = arith.constant 2.000000e+00 : f32
    %10 = vector.broadcast %cst_8 : f32 to vector<128x128xf32>
    %11 = arith.mulf %10, %4 : vector<128x128xf32>
    %12 = arith.subf %9, %11 : vector<128x128xf32>
    %cst_9 = arith.constant 0.000000e+00 : f32
    %13 = vector.broadcast %cst_9 : f32 to vector<128x128xf32>
    %14 = arith.maximumf %12, %13 : vector<128x128xf32>
    %15 = vector.broadcast %0 : f32 to vector<128x128xf32>
    %16 = arith.mulf %14, %15 : vector<128x128xf32>
    %cst_10 = arith.constant -5.000000e-01 : f32
    %17 = vector.broadcast %cst_10 : f32 to vector<128x128xf32>
    %18 = arith.mulf %17, %16 : vector<128x128xf32>
    %19 = math.exp %18 : vector<128x128xf32>
    %20 = vector.broadcast %1 : f32 to vector<128x128xf32>
    %21 = arith.mulf %20, %19 : vector<128x128xf32>
    %c0_11 = arith.constant 0 : index
    %c0_12 = arith.constant 0 : index
    %22 = vector.load %arg7[%c0_11, %c0_12] : memref<128x128xf32, #tpu.memory_space<vmem>>, vector<128x128xf32>
    tpu.vector_store %arg7[%c0_11, %c0_12], %21 {strides = array<i32>} : memref<128x128xf32, #tpu.memory_space<vmem>>, vector<128x128xf32>,
    return
  }
  func.func @transform_0(%arg0: i32, %arg1: i32) -> i32 {
    %c0_i32 = arith.constant 0 : i32
    %c0_i32_0 = arith.constant 0 : i32
    return %c0_i32 : i32
  }
  func.func @transform_1(%arg0: i32, %arg1: i32) -> (i32, i32) {
    %c0_i32 = arith.constant 0 : i32
    %c0_i32_0 = arith.constant 0 : i32
    return %arg0, %c0_i32 : i32, i32
  }
  func.func @transform_2(%arg0: i32, %arg1: i32) -> (i32, i32) {
    %c0_i32 = arith.constant 0 : i32
    %c0_i32_0 = arith.constant 0 : i32
    return %arg1, %c0_i32 : i32, i32
  }
  func.func @transform_3(%arg0: i32, %arg1: i32) -> (i32, i32) {
    %c0_i32 = arith.constant 0 : i32
    %c0_i32_0 = arith.constant 0 : i32
    return %arg0, %c0_i32 : i32, i32
  }
  func.func @transform_4(%arg0: i32, %arg1: i32) -> (i32, i32) {
    %c0_i32 = arith.constant 0 : i32
    %c0_i32_0 = arith.constant 0 : i32
    return %c0_i32, %arg1 : i32, i32
  }
  func.func @transform_5(%arg0: i32, %arg1: i32) -> (i32, i32) {
    %c0_i32 = arith.constant 0 : i32
    return %arg0, %arg1 : i32, i32
  }
}

</mosaic_0001>

<bundles_post_ra>
// kernel: tpu_custom_call.1
= control target key start
LH: loop header
LB: loop body
LE: loop exit
PB: predicated region body
PF: predicated region fallthrough
CT: control target
= control target key end

     0   :  { %10 = vsyncpa [#allocation4], 0  ;;  %s1010_s0 = inlined_call_operand.vmem [shape: f32[2], index: 0, kind: input, shape index: {}]   ;;  %s1011_s1 = inlined_call_operand.vmem [shape: f32[128,8], index: 1, kind: input, shape index: {}]   ;;  %s1012_s2 = inlined_call_operand.vmem [shape: f32[128,8], index: 2, kind: input, shape index: {}]   ;;  %s1013_s3 = inlined_call_operand.vmem [shape: f32[128,1], index: 3, kind: input, shape index: {}]   ;;  %s1014_s4 = inlined_call_operand.vmem [shape: f32[1,128], index: 4, kind: input, shape index: {}]   ;;  %s1015_s5 = inlined_call_operand.hbm [shape: f32[128,128], index: 5, kind: output, shape index: {}]  }
   0x1   :  { %11 = vsyncpa [#allocation3], 0  ;;  %s17_s20 = sshll.u32 %s1010_s0, 4  ;;  %s673_s21 = smov [#allocation2]   ;;  %s18_s20 = int_to_ptr.vmem [resolvable:$true] %s17_s20 }
   0x2   :  { %20 = dma.vmem_to_smem %s18_s20, 16, %s673_s21, [#allocation4]  }
   0x3   :  { %669 = dma.done.wait [#allocation4], 16  }
   0x4   :  { %670 = vsyncadd [#allocation4], 4294967280 }
   0x5   :  { %33 = sfence }
   0x6   :  { %v67_v0 = vld [vmem:[%s1012_s2 + $0x78] sm:$0xff]  ;;  %vm68_vm0 = vcmask 64512   ;;  %v66_v1 = vld [vmem:[%s1012_s2 + $0x70] sm:$0xff]  ;;  %v230_v2 = vld [vmem:[%s1013_s3] sm:$0xff]  ;;  %v674_v3 = vmov 0   ;;  %s675_s13 = smov [#allocation5]  }
   0x7   :  { %512 = vmatpush.xpose.msk.msra.mxu0 %vm68_vm0, %v67_v0  ;;  %544 = vmatpush.xpose.msk.msra.mxu1 %vm68_vm0, %v67_v0  ;;  %v65_v4 = vld [vmem:[%s1012_s2 + $0x68] sm:$0xff]  ;;  %v232_v5 = vld [vmem:[%s1013_s3 + $0x10] sm:$0xff]  ;;  %v64_v7 = vld [vmem:[%s1012_s2 + $0x60] sm:$0xff]  ;;  %s496_s14 = sshll.u32 %s675_s13, 4  ;;  %s498_s17 = sshll.u32 %s1015_s5, 4  ;;  %s497_s14 = int_to_ptr.vmem [resolvable:$true] %s496_s14  ;;  %s499_s17 = int_to_ptr.hbm [resolvable:$true] %s498_s17 }
   0x8   :  { %545 = vmatpush.xpose.msk.msra.mxu2 %vm68_vm0, %v67_v0  ;;  %546 = vmatpush.xpose.msk.msra.mxu3 %vm68_vm0, %v67_v0  ;;  %v231_v6 = vld [vmem:[%s1013_s3 + $0x8] sm:$0xff]  ;;  %v63_v8 = vld [vmem:[%s1012_s2 + $0x58] sm:$0xff]  ;;  %v236_v10 = vld [vmem:[%s1013_s3 + $0x30] sm:$0xff]  ;;  %s676_s18 = smov 128   ;;  %s677_s19 = smov 8  }
   0x9   :  { %597 = vset.pattern.permute.xlu0 %v674_v3  ;;  %598 = vset.pattern.permute.xlu1 %v674_v3  ;;  %v233_v9 = vld [vmem:[%s1013_s3 + $0x18] sm:$0xff]  ;;  %v62_v11 = vld [vmem:[%s1012_s2 + $0x50] sm:$0xff]  ;;  %v61_v12 = vld [vmem:[%s1012_s2 + $0x48] sm:$0xff] }
   0xa   :  { %249 = vperm.xlu0 %597, %v230_v2   ;;  %599 = vset.pattern.permute.xlu2 %v674_v3  ;;  %v237_v13 = vld [vmem:[%s1013_s3 + $0x38] sm:$0xff]  ;;  %v239_v14 = vld [vmem:[%s1013_s3 + $0x48] sm:$0xff]  ;;  %v60_v15 = vld [vmem:[%s1012_s2 + $0x40] sm:$0xff] }
   0xb   :  { %513 = vmatpush.xpose.msk.msra.mxu0 %vm68_vm0, %v66_v1  ;;  %547 = vmatpush.xpose.msk.msra.mxu1 %vm68_vm0, %v66_v1  ;;  %v59_v16 = vld [vmem:[%s1012_s2 + $0x38] sm:$0xff]  ;;  %v242_v17 = vld [vmem:[%s1013_s3 + $0x60] sm:$0xff]  ;;  %v240_v19 = vld [vmem:[%s1013_s3 + $0x50] sm:$0xff] }
   0xc   :  { %548 = vmatpush.xpose.msk.msra.mxu2 %vm68_vm0, %v66_v1  ;;  %549 = vmatpush.xpose.msk.msra.mxu3 %vm68_vm0, %v66_v1  ;;  %v234_v18 = vld [vmem:[%s1013_s3 + $0x20] sm:$0xff]  ;;  %v58_v20 = vld [vmem:[%s1012_s2 + $0x30] sm:$0xff]  ;;  %v57_v21 = vld [vmem:[%s1012_s2 + $0x28] sm:$0xff] }
   0xd   :  { %259 = vperm.xlu1 %598, %v232_v5   ;;  %269 = vperm.xlu2 %599, %v234_v18   ;;  %v245_v22 = vld [vmem:[%s1013_s3 + $0x78] sm:$0xff]  ;;  %v235_v23 = vld [vmem:[%s1013_s3 + $0x28] sm:$0xff]  ;;  %v56_v25 = vld [vmem:[%s1012_s2 + $0x20] sm:$0xff] }
   0xe   :  { %v243_v24 = vld [vmem:[%s1013_s3 + $0x68] sm:$0xff]  ;;  %v55_v26 = vld [vmem:[%s1012_s2 + $0x18] sm:$0xff]  ;;  %v238_v27 = vld [vmem:[%s1013_s3 + $0x40] sm:$0xff] }
   0xf   :  { %514 = vmatpush.xpose.msk.msra.mxu0 %vm68_vm0, %v65_v4  ;;  %550 = vmatpush.xpose.msk.msra.mxu1 %vm68_vm0, %v65_v4  ;;  %v54_v28 = vld [vmem:[%s1012_s2 + $0x10] sm:$0xff]  ;;  %v53_v29 = vld [vmem:[%s1012_s2 + $0x8] sm:$0xff]  ;;  %v241_v30 = vld [vmem:[%s1013_s3 + $0x58] sm:$0xff] }
  0x10   :  { %551 = vmatpush.xpose.msk.msra.mxu2 %vm68_vm0, %v65_v4  ;;  %552 = vmatpush.xpose.msk.msra.mxu3 %vm68_vm0, %v65_v4  ;;  %v52_v31 = vld [vmem:[%s1012_s2] sm:$0xff]  ;;  %v244_v36 = vld [vmem:[%s1013_s3 + $0x70] sm:$0xff]  ;;  %v37_v37 = vld [vmem:[%s1011_s1 + $0x8] sm:$0xff]  ;;  %s34_s2 = sld [smem:[#allocation2]] }
  0x11   :  { %v36_v32 = vld [vmem:[%s1011_s1] sm:$0xff]  ;;  %v41_v38 = vld [vmem:[%s1011_s1 + $0x28] sm:$0xff]  ;;  %v38_v41 = vld [vmem:[%s1011_s1 + $0x10] sm:$0xff] }
  0x12   :  { %254 = vperm.xlu0 %597, %v231_v6   ;;  %v40_v33 = vld [vmem:[%s1011_s1 + $0x20] sm:$0xff]  ;;  %v45_v39 = vld [vmem:[%s1011_s1 + $0x48] sm:$0xff]  ;;  %v42_v42 = vld [vmem:[%s1011_s1 + $0x30] sm:$0xff] }
  0x13   :  { %515 = vmatpush.xpose.msk.msra.mxu0 %vm68_vm0, %v64_v7  ;;  %553 = vmatpush.xpose.msk.msra.mxu1 %vm68_vm0, %v64_v7  ;;  %v44_v34 = vld [vmem:[%s1011_s1 + $0x40] sm:$0xff]  ;;  %v49_v40 = vld [vmem:[%s1011_s1 + $0x68] sm:$0xff]  ;;  %v46_v43 = vld [vmem:[%s1011_s1 + $0x50] sm:$0xff] }
  0x14   :  { %554 = vmatpush.xpose.msk.msra.mxu2 %vm68_vm0, %v64_v7  ;;  %555 = vmatpush.xpose.msk.msra.mxu3 %vm68_vm0, %v64_v7  ;;  %v48_v35 = vld [vmem:[%s1011_s1 + $0x60] sm:$0xff]  ;;  %v50_v44 = vld [vmem:[%s1011_s1 + $0x70] sm:$0xff]  ;;  %v39_v45 = vld [vmem:[%s1011_s1 + $0x18] sm:$0xff] }
  0x15   :  { %264 = vperm.xlu1 %598, %v233_v9   ;;  %274 = vperm.xlu2 %599, %v235_v23   ;;  %v43_v46 = vld [vmem:[%s1011_s1 + $0x38] sm:$0xff]  ;;  %v938_v58 = vld [vmem:[%s1014_s4] ss:$0 sm:$0xff]  ;;  %s948_s4 = sld [smem:[#allocation2 + $0x1]] }
  0x16   :  { %v47_v47 = vld [vmem:[%s1011_s1 + $0x58] sm:$0xff]  ;;  %v944_v5 = vstv %s34_s2 }
  0x17   :  { %516 = vmatpush.xpose.msk.msra.mxu0 %vm68_vm0, %v63_v8  ;;  %556 = vmatpush.xpose.msk.msra.mxu1 %vm68_vm0, %v63_v8  ;;  %v51_v48 = vld [vmem:[%s1011_s1 + $0x78] sm:$0xff] }
  0x18   :  { %557 = vmatpush.xpose.msk.msra.mxu2 %vm68_vm0, %v63_v8  ;;  %558 = vmatpush.xpose.msk.msra.mxu3 %vm68_vm0, %v63_v8 }
  0x1a   :  { %279 = vperm.xlu0 %597, %v236_v10  }
  0x1b   :  { %517 = vmatpush.xpose.msk.msra.mxu0 %vm68_vm0, %v62_v11  ;;  %559 = vmatpush.xpose.msk.msra.mxu1 %vm68_vm0, %v62_v11 }
  0x1c   :  { %560 = vmatpush.xpose.msk.msra.mxu2 %vm68_vm0, %v62_v11  ;;  %561 = vmatpush.xpose.msk.msra.mxu3 %vm68_vm0, %v62_v11 }
  0x1d   :  { %284 = vperm.xlu1 %598, %v237_v13   ;;  %289 = vperm.xlu2 %599, %v238_v27  }
  0x1f   :  { %518 = vmatpush.xpose.msk.msra.mxu0 %vm68_vm0, %v61_v12  ;;  %562 = vmatpush.xpose.msk.msra.mxu1 %vm68_vm0, %v61_v12 }
  0x20   :  { %563 = vmatpush.xpose.msk.msra.mxu2 %vm68_vm0, %v61_v12  ;;  %564 = vmatpush.xpose.msk.msra.mxu3 %vm68_vm0, %v61_v12 }
  0x22   :  { %294 = vperm.xlu0 %597, %v239_v14  }
  0x23   :  { %519 = vmatpush.xpose.msk.msra.mxu0 %vm68_vm0, %v60_v15  ;;  %565 = vmatpush.xpose.msk.msra.mxu1 %vm68_vm0, %v60_v15 }
  0x24   :  { %566 = vmatpush.xpose.msk.msra.mxu2 %vm68_vm0, %v60_v15  ;;  %567 = vmatpush.xpose.msk.msra.mxu3 %vm68_vm0, %v60_v15 }
  0x25   :  { %299 = vperm.xlu1 %598, %v240_v19   ;;  %304 = vperm.xlu2 %599, %v241_v30  }
  0x27   :  { %520 = vmatpush.xpose.msk.msra.mxu0 %vm68_vm0, %v59_v16  ;;  %568 = vmatpush.xpose.msk.msra.mxu1 %vm68_vm0, %v59_v16 }
  0x28   :  { %569 = vmatpush.xpose.msk.msra.mxu2 %vm68_vm0, %v59_v16  ;;  %570 = vmatpush.xpose.msk.msra.mxu3 %vm68_vm0, %v59_v16 }
  0x2a   :  { %309 = vperm.xlu0 %597, %v242_v17  }
  0x2b   :  { %521 = vmatpush.xpose.msk.msra.mxu0 %vm68_vm0, %v58_v20  ;;  %571 = vmatpush.xpose.msk.msra.mxu1 %vm68_vm0, %v58_v20 }
  0x2c   :  { %572 = vmatpush.xpose.msk.msra.mxu2 %vm68_vm0, %v58_v20  ;;  %573 = vmatpush.xpose.msk.msra.mxu3 %vm68_vm0, %v58_v20 }
  0x2d   :  { %314 = vperm.xlu1 %598, %v243_v24   ;;  %319 = vperm.xlu2 %599, %v244_v36  }
  0x2f   :  { %522 = vmatpush.xpose.msk.msra.mxu0 %vm68_vm0, %v57_v21  ;;  %574 = vmatpush.xpose.msk.msra.mxu1 %vm68_vm0, %v57_v21 }
  0x30   :  { %575 = vmatpush.xpose.msk.msra.mxu2 %vm68_vm0, %v57_v21  ;;  %576 = vmatpush.xpose.msk.msra.mxu3 %vm68_vm0, %v57_v21 }
  0x32   :  { %324 = vperm.xlu0 %597, %v245_v22  }
  0x33   :  { %523 = vmatpush.xpose.msk.msra.mxu0 %vm68_vm0, %v56_v25  ;;  %577 = vmatpush.xpose.msk.msra.mxu1 %vm68_vm0, %v56_v25 }
  0x34   :  { %578 = vmatpush.xpose.msk.msra.mxu2 %vm68_vm0, %v56_v25  ;;  %579 = vmatpush.xpose.msk.msra.mxu3 %vm68_vm0, %v56_v25 }
  0x37   :  { %524 = vmatpush.xpose.msk.msra.mxu0 %vm68_vm0, %v55_v26  ;;  %580 = vmatpush.xpose.msk.msra.mxu1 %vm68_vm0, %v55_v26 }
  0x38   :  { %581 = vmatpush.xpose.msk.msra.mxu2 %vm68_vm0, %v55_v26  ;;  %582 = vmatpush.xpose.msk.msra.mxu3 %vm68_vm0, %v55_v26 }
  0x3b   :  { %525 = vmatpush.xpose.msk.msra.mxu0 %vm68_vm0, %v54_v28  ;;  %583 = vmatpush.xpose.msk.msra.mxu1 %vm68_vm0, %v54_v28 }
  0x3c   :  { %584 = vmatpush.xpose.msk.msra.mxu2 %vm68_vm0, %v54_v28  ;;  %585 = vmatpush.xpose.msk.msra.mxu3 %vm68_vm0, %v54_v28 }
  0x3f   :  { %526 = vmatpush.xpose.msk.msra.mxu0 %vm68_vm0, %v53_v29  ;;  %586 = vmatpush.xpose.msk.msra.mxu1 %vm68_vm0, %v53_v29 }
  0x40   :  { %587 = vmatpush.xpose.msk.msra.mxu2 %vm68_vm0, %v53_v29  ;;  %588 = vmatpush.xpose.msk.msra.mxu3 %vm68_vm0, %v53_v29 }
  0x43   :  { %527 = vmatpush.xpose.msk.msra.mxu0 %vm68_vm0, %v52_v31  ;;  %589 = vmatpush.xpose.msk.msra.mxu1 %vm68_vm0, %v52_v31 }
  0x44   :  { %590 = vmatpush.xpose.msk.msra.mxu2 %vm68_vm0, %v52_v31  ;;  %591 = vmatpush.xpose.msk.msra.mxu3 %vm68_vm0, %v52_v31 }
  0x46   :  { %528 = vmatmul.msk.f32.vlgmr.msra.gmra.mxu0 %vm68_vm0, %v36_v32  ;;  %532 = vmatmul.msk.f32.vlgmr.msra.gmra.mxu1 %vm68_vm0, %v40_v33 }
  0x47   :  { %536 = vmatmul.msk.f32.vlgmr.msra.gmra.mxu2 %vm68_vm0, %v44_v34  ;;  %540 = vmatmul.msk.f32.vlgmr.msra.gmra.mxu3 %vm68_vm0, %v48_v35 }
  0x4e   :  { %529 = vmatmul.msk.f32.gmra.mxu0 %vm68_vm0, %v37_v37  ;;  %533 = vmatmul.msk.f32.gmra.mxu1 %vm68_vm0, %v41_v38 }
  0x4f   :  { %537 = vmatmul.msk.f32.gmra.mxu2 %vm68_vm0, %v45_v39  ;;  %541 = vmatmul.msk.f32.gmra.mxu3 %vm68_vm0, %v49_v40 }
  0x56   :  { %530 = vmatmul.msk.f32.gmra.mxu0 %vm68_vm0, %v38_v41  ;;  %534 = vmatmul.msk.f32.gmra.mxu1 %vm68_vm0, %v42_v42 }
  0x57   :  { %538 = vmatmul.msk.f32.gmra.mxu2 %vm68_vm0, %v46_v43  ;;  %542 = vmatmul.msk.f32.gmra.mxu3 %vm68_vm0, %v50_v44 }
  0x5e   :  { %531 = vmatmul.msk.f32.gmra.mxu0 %vm68_vm0, %v39_v45  ;;  %535 = vmatmul.msk.f32.gmra.mxu1 %vm68_vm0, %v43_v46  ;;  %v970_v46 = vstv %s948_s4 }
  0x5f   :  { %539 = vmatmul.msk.f32.gmra.mxu2 %vm68_vm0, %v47_v47  ;;  %543 = vmatmul.msk.f32.gmra.mxu3 %vm68_vm0, %v51_v48 }
  0x67   :  { %v270_v52 = vpop.permute.xlu2 %269 }
  0x68   :  { %v334_v63 = vadd.f32 %v938_v58, %v270_v52 }
  0x6f   :  { %v275_v55 = vpop.permute.xlu2 %274 }
  0x70   :  { %v335_v10 = vadd.f32 %v938_v58, %v275_v55 }
  0x77   :  { %v290_v59 = vpop.permute.xlu2 %289 }
  0x78   :  { %v338_v15 = vadd.f32 %v938_v58, %v290_v59 }
  0x7c   :  { %v250_v49 = vpop.permute.xlu0 %249 }
  0x7d   :  { %v330_v62 = vadd.f32 %v938_v58, %v250_v49 }
  0x7f   :  { %v260_v50 = vpop.permute.xlu1 %259  ;;  %v305_v27 = vpop.permute.xlu2 %304 }
  0x80   :  { %v332_v25 = vadd.f32 %v938_v58, %v260_v50  ;;  %v964_v42 = vadd.f32 %v938_v58, %v305_v27 }
  0x84   :  { %v255_v51 = vpop.permute.xlu0 %254 }
  0x85   :  { %v331_v9 = vadd.f32 %v938_v58, %v255_v51 }
  0x87   :  { %v265_v53 = vpop.permute.xlu1 %264 }
  0x88   :  { %v956_v26 = vadd.f32 %v938_v58, %v265_v53 }
  0x8c   :  { %v280_v54 = vpop.permute.xlu0 %279 }
  0x8d   :  { %v336_v34 = vadd.f32 %v938_v58, %v280_v54 }
  0x8f   :  { %v285_v56 = vpop.permute.xlu1 %284 }
  0x90   :  { %v960_v35 = vadd.f32 %v938_v58, %v285_v56 }
  0x94   :  { %v295_v57 = vpop.permute.xlu0 %294 }
  0x95   :  { %v339_v39 = vadd.f32 %v938_v58, %v295_v57 }
  0x97   :  { %v942_v2 = vpop.permute.xlu1 %299 }
  0x9c   :  { %v310_v8 = vpop.permute.xlu0 %309 }
  0x9d   :  { %v342_v16 = vadd.f32 %v938_v58, %v310_v8 }
  0x9f   :  { %v315_v36 = vpop.permute.xlu1 %314 }
  0xa0   :  { %v343_v45 = vadd.f32 %v938_v58, %v315_v36 }
  0xc3   :  { %v182_v60 = vpop.f32.mrf.mxu0  ;;  %v194_v61 = vpop.f32.mrf.mxu1 }
  0xc4   :  { %v346_v0 = vmul.f32 2.0, %v182_v60  ;;  %v350_v1 = vmul.f32 2.0, %v194_v61 }
  0xc6   :  { %v362_v3 = vsub.f32 %v330_v62, %v346_v0  ;;  %v366_v4 = vsub.f32 %v334_v63, %v350_v1 }
  0xc8   :  { %v378_v6 = vmax.f32 %v362_v3, 0.0  ;;  %v382_v7 = vmax.f32 %v366_v4, 0.0 }
  0xca   :  { %v395_v11 = vmul.f32 %v944_v5, %v378_v6  ;;  %v399_v12 = vmul.f32 %v944_v5, %v382_v7  ;;  %v206_v13 = vpop.f32.mrf.mxu2  ;;  %v218_v14 = vpop.f32.mrf.mxu3 }
  0xcb   :  { %v354_v17 = vmul.f32 2.0, %v206_v13  ;;  %v358_v18 = vmul.f32 2.0, %v218_v14  ;;  %v185_v19 = vpop.f32.mrf.mxu0  ;;  %v197_v20 = vpop.f32.mrf.mxu1 }
  0xcc   :  { %v411_v21 = vmul.f32 -0.5, %v395_v11  ;;  %v415_v22 = vmul.f32 -0.5, %v399_v12  ;;  %v347_v23 = vmul.f32 2.0, %v185_v19  ;;  %v351_v24 = vmul.f32 2.0, %v197_v20 }
  0xcd   :  { %v370_v28 = vsub.f32 %v338_v15, %v354_v17  ;;  %v374_v29 = vsub.f32 %v342_v16, %v358_v18  ;;  %v340_v17 = vadd.f32 %v938_v58, %v942_v2 }
  0xce   :  { %v427_v30 = vmul.f32 1.442695, %v411_v21  ;;  %v435_v31 = vmul.f32 1.442695, %v415_v22  ;;  %v363_v32 = vsub.f32 %v331_v9, %v347_v23  ;;  %v367_v33 = vsub.f32 %v335_v10, %v351_v24  ;;  %v320_v10 = vpop.permute.xlu2 %319 }
  0xcf   :  { %v386_v37 = vmax.f32 %v370_v28, 0.0  ;;  %v390_v38 = vmax.f32 %v374_v29, 0.0  ;;  %v344_v20 = vadd.f32 %v938_v58, %v320_v10 }
  0xd0   :  { %601 = vpow2.f32 %v427_v30  ;;  %v379_v40 = vmax.f32 %v363_v32, 0.0  ;;  %v383_v41 = vmax.f32 %v367_v33, 0.0 }
  0xd1   :  { %603 = vpow2.f32 %v435_v31  ;;  %v403_v43 = vmul.f32 %v944_v5, %v386_v37  ;;  %v407_v44 = vmul.f32 %v944_v5, %v390_v38 }
  0xd2   :  { %v396_v47 = vmul.f32 %v944_v5, %v379_v40  ;;  %v400_v48 = vmul.f32 %v944_v5, %v383_v41  ;;  %v209_v49 = vpop.f32.mrf.mxu2  ;;  %v221_v50 = vpop.f32.mrf.mxu3 }
  0xd3   :  { %v419_v51 = vmul.f32 -0.5, %v403_v43  ;;  %v423_v52 = vmul.f32 -0.5, %v407_v44  ;;  %v355_v53 = vmul.f32 2.0, %v209_v49  ;;  %v359_v54 = vmul.f32 2.0, %v221_v50  ;;  %v188_v55 = vpop.f32.mrf.mxu0  ;;  %v200_v56 = vpop.f32.mrf.mxu1 }
  0xd4   :  { %v412_v57 = vmul.f32 -0.5, %v396_v47  ;;  %v416_v59 = vmul.f32 -0.5, %v400_v48  ;;  %v348_v60 = vmul.f32 2.0, %v188_v55  ;;  %v352_v61 = vmul.f32 2.0, %v200_v56  ;;  %v325_v49 = vpop.permute.xlu0 %324 }
  0xd5   :  { %v443_v62 = vmul.f32 1.442695, %v419_v51  ;;  %v451_v63 = vmul.f32 1.442695, %v423_v52  ;;  %v371_v0 = vsub.f32 %v339_v39, %v355_v53  ;;  %v375_v1 = vsub.f32 %v343_v45, %v359_v54 }
  0xd6   :  { %v602_v3 = vpop.eup %601  ;;  %v429_v4 = vmul.f32 1.442695, %v412_v57  ;;  %v437_v6 = vmul.f32 1.442695, %v416_v59  ;;  %v364_v7 = vsub.f32 %v332_v25, %v348_v60  ;;  %v368_v8 = vsub.f32 %v336_v34, %v352_v61 }
  0xd7   :  { %v604_v9 = vpop.eup %603  ;;  %v460_v11 = vmul.f32 %v602_v3, %v970_v46  ;;  %605 = vpow2.f32 %v443_v62  ;;  %v387_v12 = vmax.f32 %v371_v0, 0.0  ;;  %v391_v13 = vmax.f32 %v375_v1, 0.0 }
  0xd8   :  { %v464_v14 = vmul.f32 %v604_v9, %v970_v46  ;;  %607 = vpow2.f32 %v451_v63  ;;  %v380_v15 = vmax.f32 %v364_v7, 0.0  ;;  %v384_v16 = vmax.f32 %v368_v8, 0.0 }
  0xd9   :  { %476 = vst [vmem:[#allocation5] sm:$0xff] %v460_v11  ;;  %609 = vpow2.f32 %v429_v4  ;;  %v404_v18 = vmul.f32 %v944_v5, %v387_v12  ;;  %v408_v19 = vmul.f32 %v944_v5, %v391_v13  ;;  %v345_v60 = vadd.f32 %v938_v58, %v325_v49 }
  0xda   :  { %480 = vst [vmem:[#allocation5 + $0x20] sm:$0xff] %v464_v14  ;;  %611 = vpow2.f32 %v437_v6  ;;  %v397_v21 = vmul.f32 %v944_v5, %v380_v15  ;;  %v401_v22 = vmul.f32 %v944_v5, %v384_v16  ;;  %v212_v23 = vpop.f32.mrf.mxu2  ;;  %v224_v24 = vpop.f32.mrf.mxu3 }
  0xdb   :  { %v420_v25 = vmul.f32 -0.5, %v404_v18  ;;  %v424_v27 = vmul.f32 -0.5, %v408_v19  ;;  %v356_v28 = vmul.f32 2.0, %v212_v23  ;;  %v360_v2 = vmul.f32 2.0, %v224_v24  ;;  %v191_v29 = vpop.f32.mrf.mxu0  ;;  %v203_v30 = vpop.f32.mrf.mxu1 }
  0xdc   :  { %v413_v31 = vmul.f32 -0.5, %v397_v21  ;;  %v417_v32 = vmul.f32 -0.5, %v401_v22  ;;  %v349_v33 = vmul.f32 2.0, %v191_v29  ;;  %v353_v34 = vmul.f32 2.0, %v203_v30 }
  0xdd   :  { %v606_v36 = vpop.eup %605  ;;  %v445_v37 = vmul.f32 1.442695, %v420_v25  ;;  %v453_v38 = vmul.f32 1.442695, %v424_v27  ;;  %v372_v39 = vsub.f32 %v340_v17, %v356_v28  ;;  %v376_v40 = vsub.f32 %v344_v20, %v360_v2 }
  0xde   :  { %v608_v41 = vpop.eup %607  ;;  %v468_v43 = vmul.f32 %v606_v36, %v970_v46  ;;  %v431_v44 = vmul.f32 1.442695, %v413_v31  ;;  %v439_v45 = vmul.f32 1.442695, %v417_v32  ;;  %v365_v47 = vsub.f32 %v956_v26, %v349_v33 }
  0xdf   :  { %v610_v48 = vpop.eup %609  ;;  %v472_v50 = vmul.f32 %v608_v41, %v970_v46  ;;  %613 = vpow2.f32 %v445_v37  ;;  %v388_v51 = vmax.f32 %v372_v39, 0.0  ;;  %v392_v52 = vmax.f32 %v376_v40, 0.0 }
  0xe0   :  { %v612_v53 = vpop.eup %611  ;;  %484 = vst [vmem:[#allocation5 + $0x40] sm:$0xff] %v468_v43  ;;  %v461_v54 = vmul.f32 %v610_v48, %v970_v46  ;;  %615 = vpow2.f32 %v453_v38  ;;  %v381_v55 = vmax.f32 %v365_v47, 0.0  ;;  %v369_v56 = vsub.f32 %v960_v35, %v353_v34 }
  0xe1   :  { %488 = vst [vmem:[#allocation5 + $0x60] sm:$0xff] %v472_v50  ;;  %v465_v57 = vmul.f32 %v612_v53, %v970_v46  ;;  %617 = vpow2.f32 %v431_v44  ;;  %v405_v26 = vmul.f32 %v944_v5, %v388_v51  ;;  %v409_v59 = vmul.f32 %v944_v5, %v392_v52 }
  0xe2   :  { %477 = vst [vmem:[#allocation5 + $0x8] sm:$0xff] %v461_v54  ;;  %619 = vpow2.f32 %v439_v45  ;;  %v398_v61 = vmul.f32 %v944_v5, %v381_v55  ;;  %v385_v62 = vmax.f32 %v369_v56, 0.0  ;;  %v215_v63 = vpop.f32.mrf.mxu2  ;;  %v227_v0 = vpop.f32.mrf.mxu3 }
  0xe3   :  { %481 = vst [vmem:[#allocation5 + $0x28] sm:$0xff] %v465_v57  ;;  %v421_v1 = vmul.f32 -0.5, %v405_v26  ;;  %v425_v35 = vmul.f32 -0.5, %v409_v59  ;;  %v357_v3 = vmul.f32 2.0, %v215_v63  ;;  %v361_v4 = vmul.f32 2.0, %v227_v0 }
  0xe4   :  { %v414_v6 = vmul.f32 -0.5, %v398_v61  ;;  %v402_v7 = vmul.f32 %v944_v5, %v385_v62 }
  0xe5   :  { %v614_v8 = vpop.eup %613  ;;  %v447_v9 = vmul.f32 1.442695, %v421_v1  ;;  %v455_v10 = vmul.f32 1.442695, %v425_v35  ;;  %v373_v58 = vsub.f32 %v964_v42, %v357_v3  ;;  %v377_v11 = vsub.f32 %v345_v60, %v361_v4 }
  0xe6   :  { %v616_v12 = vpop.eup %615  ;;  %v469_v13 = vmul.f32 %v614_v8, %v970_v46  ;;  %v433_v14 = vmul.f32 1.442695, %v414_v6  ;;  %v418_v15 = vmul.f32 -0.5, %v402_v7 }
  0xe7   :  { %v618_v16 = vpop.eup %617  ;;  %v473_v17 = vmul.f32 %v616_v12, %v970_v46  ;;  %621 = vpow2.f32 %v447_v9  ;;  %v389_v18 = vmax.f32 %v373_v58, 0.0  ;;  %v393_v19 = vmax.f32 %v377_v11, 0.0 }
  0xe8   :  { %v620_v20 = vpop.eup %619  ;;  %485 = vst [vmem:[#allocation5 + $0x48] sm:$0xff] %v469_v13  ;;  %v462_v21 = vmul.f32 %v618_v16, %v970_v46  ;;  %623 = vpow2.f32 %v455_v10  ;;  %v441_v22 = vmul.f32 1.442695, %v418_v15 }
  0xe9   :  { %489 = vst [vmem:[#allocation5 + $0x68] sm:$0xff] %v473_v17  ;;  %v466_v42 = vmul.f32 %v620_v20, %v970_v46  ;;  %625 = vpow2.f32 %v433_v14  ;;  %v406_v23 = vmul.f32 %v944_v5, %v389_v18  ;;  %v410_v24 = vmul.f32 %v944_v5, %v393_v19 }
  0xea   :  { %478 = vst [vmem:[#allocation5 + $0x10] sm:$0xff] %v462_v21  ;;  %627 = vpow2.f32 %v441_v22 }
  0xeb   :  { %482 = vst [vmem:[#allocation5 + $0x30] sm:$0xff] %v466_v42  ;;  %v422_v25 = vmul.f32 -0.5, %v406_v23  ;;  %v426_v27 = vmul.f32 -0.5, %v410_v24 }
  0xed   :  { %v622_v28 = vpop.eup %621  ;;  %v449_v2 = vmul.f32 1.442695, %v422_v25  ;;  %v457_v29 = vmul.f32 1.442695, %v426_v27 }
  0xee   :  { %v624_v30 = vpop.eup %623  ;;  %v470_v31 = vmul.f32 %v622_v28, %v970_v46 }
  0xef   :  { %v626_v32 = vpop.eup %625  ;;  %v474_v33 = vmul.f32 %v624_v30, %v970_v46  ;;  %629 = vpow2.f32 %v449_v2 }
  0xf0   :  { %v628_v34 = vpop.eup %627  ;;  %486 = vst [vmem:[#allocation5 + $0x50] sm:$0xff] %v470_v31  ;;  %v463_v36 = vmul.f32 %v626_v32, %v970_v46  ;;  %631 = vpow2.f32 %v457_v29 }
  0xf1   :  { %490 = vst [vmem:[#allocation5 + $0x70] sm:$0xff] %v474_v33  ;;  %v467_v5 = vmul.f32 %v628_v34, %v970_v46 }
  0xf2   :  { %479 = vst [vmem:[#allocation5 + $0x18] sm:$0xff] %v463_v36 }
  0xf3   :  { %483 = vst [vmem:[#allocation5 + $0x38] sm:$0xff] %v467_v5 }
  0xf5   :  { %v630_v37 = vpop.eup %629 }
  0xf6   :  { %v632_v38 = vpop.eup %631  ;;  %v471_v39 = vmul.f32 %v630_v37, %v970_v46 }
  0xf7   :  { %v475_v40 = vmul.f32 %v632_v38, %v970_v46 }
  0xf8   :  { %487 = vst [vmem:[#allocation5 + $0x58] sm:$0xff] %v471_v39 }
  0xf9   :  { %491 = vst [vmem:[#allocation5 + $0x78] sm:$0xff] %v475_v40 }
  0xfa   :  { %504 = dma.vmem_to_hbm [thread:$0]  %s497_s14, 2048, %s499_s17, [#allocation3], %s676_s18, %s676_s18, %s677_s19  }
  0xfb   :  { %671 = dma.done.wait [#allocation3], 2048  }
  0xfc   :  { %672 = vsyncadd [#allocation3], 4294965248 }
  0xfd   :  { %509 = vsyncpa [#allocation3], 1 }
  0xfe   :  { %510 = vsyncpa [#allocation4], 1 }

</bundles_post_ra>
